<compile_context>
chip_gen: v6e
topology: v6e:2x2x1
jax: 0.10.0
libtpu: 0.0.40
codegen_flags: <defaults>
</compile_context>

<pallas_src>
import jax
import jax.numpy as jnp
from jax.experimental import pallas as pl
from jax.experimental.pallas import tpu as pltpu

_EPS = 1e-8
_NUM_ITERS = 3


def dynamic_routing_kernel(x_ref, w_ref, o_ref):
    """One batch tile of dynamic routing.

    x_ref: (tb, n_pad, d_in)  node features (padded node rows are all-zero)
    w_ref: (d_in, d_pad)      shared projection, out dim zero-padded to 128*k
    o_ref: (tb, d_pad)        routed global representation (lane-dense 2-D)
    """
    tb, n_pad, d_in = x_ref.shape
    d_pad = w_ref.shape[1]
    f32 = jnp.float32

    # ---- projection: one big lane-dense MXU matmul --------------------------
    # Operands stay in their storage dtype; accumulate in f32.  n_pad % 8 == 0,
    # so collapsing the two leading dims is layout-free.
    x = x_ref[...]
    w = w_ref[...]
    rep = jnp.dot(
        x.reshape(tb * n_pad, d_in), w, preferred_element_type=f32
    ).reshape(tb, n_pad, d_pad)                                    # (tb,n,d) f32

    # ---- per-node mask (2-D, lane-dense over nodes) --------------------------
    # Zero-padded node rows (and any genuinely all-zero node) are excluded,
    # exactly like the torch module's r_sum == 0 mask; relies on the padding
    # being exact zeros (it is, via jnp.pad).
    r_sum = jnp.sum(rep, axis=-1)                                  # (tb, n)
    label = r_sum == 0.0
    neg_inf = f32(-jnp.inf)
    eps = f32(_EPS)

    # ---- Gram matrix: all <rep_i, rep_j>, once, on the MXU -------------------
    gram = jax.lax.dot_general(
        rep, rep,
        dimension_numbers=(((2,), (2,)), ((0,), (0,))),
        preferred_element_type=f32)                                # (tb, n, n)

    # ||rep_i||^2 = G[i,i]  (diagonal via an iota mask; no extra pass over rep)
    rows = jax.lax.broadcasted_iota(jnp.int32, (n_pad, n_pad), 0)
    cols = jax.lax.broadcasted_iota(jnp.int32, (n_pad, n_pad), 1)
    diag = (rows == cols)[None]                                    # (1, n, n)
    rep_sq = jnp.sum(jnp.where(diag, gram, f32(0.0)), axis=-1)     # (tb, n)
    rep_norm_c = jnp.maximum(jnp.sqrt(rep_sq), eps)                # torch-style eps

    b = jnp.where(label, neg_inf, f32(0.0))                        # (tb, n)
    c = jnp.zeros_like(b)
    for it in range(_NUM_ITERS):
        # softmax over nodes (lane axis); reciprocal goes to the EUP slot.
        m = jnp.max(b, axis=-1, keepdims=True)                     # (tb, 1)
        e = jnp.exp(b - m)                                         # (tb, n)
        c = e * pl.reciprocal(jnp.sum(e, axis=-1, keepdims=True), approx=True)
        # The torch module's last-iteration similarity update never feeds the
        # returned rg, so it is skipped (output is bit-for-bit the same logic).
        if it + 1 < _NUM_ITERS:
            # dots_i = <rep_i, rg> = (G c)_i ;  ||rg||^2 = c^T G c = <c, dots>
            dots = jnp.sum(gram * c[:, None, :], axis=-1)          # (tb, n)
            rg_sq = jnp.maximum(
                jnp.sum(c * dots, axis=-1, keepdims=True), f32(0.0))  # (tb, 1)
            rg_norm_c = jnp.maximum(jnp.sqrt(rg_sq), eps)
            sim = dots * pl.reciprocal(rep_norm_c * rg_norm_c, approx=True)
            b = jnp.where(label, neg_inf, sim)

    # ---- final routed representation: single weighted pass over rep ----------
    rg = jnp.sum(c[:, :, None] * rep, axis=1)                      # (tb, d_pad)
    o_ref[...] = rg.astype(o_ref.dtype)


def _pick_batch_tile(B, n_pad, d_in, d_pad, budget_bytes):
    """Largest batch tile whose live VMEM fits `budget_bytes` (with slack)."""
    lanes_in = 128 * pl.cdiv(d_in, 128)          # x last dim pads to 128 lanes
    bytes_per_row = 4 * (
        2 * n_pad * d_pad                        # rep (live across loop) + 1 temp
        + n_pad * max(n_pad, 128)                # Gram matrix (lane-padded)
        + 2 * n_pad * lanes_in                   # double-buffered x tile
        + 2 * d_pad                              # double-buffered output tile
        + 8 * 128                                # per-node scalar vectors
    )
    fixed = 4 * 2 * (8 * pl.cdiv(d_in, 8)) * d_pad   # double-buffered W block
    avail = max(budget_bytes - fixed, bytes_per_row)
    tb = max(1, avail // bytes_per_row)
    # For large batches keep >=4 grid steps: deep DMA pipeline + both v7x TCs
    # get work on the ("parallel",) batch axis.
    if B >= 32:
        tb = min(tb, pl.cdiv(B, 4))
    if tb >= B:
        return B
    # Sublane-align the (tb, d_pad) output block; tb == B is always legal.
    tb = max(8, (tb // 8) * 8)
    return min(tb, B)


def dynamic_routing_forward(x, W, *, tb=None, vmem_budget_bytes=None):
    """x: (B, N, in_dim).  W: (in_dim, out_dim) or torch-style (1, in_dim, out_dim)."""
    if W.ndim == 3:               # accept the PyTorch parameter layout (1, in, out)
        W = W[0]
    B, N, d_in = x.shape
    assert W.shape[0] == d_in
    d_out = W.shape[1]

    d_pad = 128 * pl.cdiv(d_out, 128)     # lane-dense output / MXU N dimension
    n_pad = 8 * pl.cdiv(N, 8)             # sublane-aligned node count

    w_p = jnp.pad(W, ((0, 0), (0, d_pad - d_out))) if d_pad != d_out else W
    x_p = jnp.pad(x, ((0, 0), (0, n_pad - N), (0, 0))) if n_pad != N else x

    # ---- per-generation VMEM budget ------------------------------------------
    try:
        vmem_capacity = int(pltpu.get_tpu_info().vmem_capacity_bytes)
    except Exception:
        vmem_capacity = 64 * 1024 * 1024       # v7x per-TC size (most conservative)
    if vmem_budget_bytes is None:
        vmem_budget_bytes = int(0.40 * vmem_capacity)   # ~25 MiB v7x, ~51 MiB v5e/v6e
    vmem_limit = max(32 * 1024 * 1024, int(0.75 * vmem_capacity))

    if tb is None:
        tb = _pick_batch_tile(B, n_pad, d_in, d_pad, vmem_budget_bytes)
    grid = (pl.cdiv(B, tb),)

    itemsize = jnp.dtype(x.dtype).itemsize
    cost = pl.CostEstimate(
        flops=(2 * B * n_pad * d_in * d_pad          # projection matmul
               + 2 * B * n_pad * n_pad * d_pad       # Gram matrix
               + 6 * B * n_pad * d_pad),             # r_sum / final weighted sum
        transcendentals=(_NUM_ITERS + 4) * B * n_pad,
        bytes_accessed=(x_p.size * itemsize
                        + w_p.size * itemsize
                        + B * d_pad * itemsize),
    )

    out = pl.pallas_call(
        dynamic_routing_kernel,
        out_shape=jax.ShapeDtypeStruct((B, d_pad), x.dtype),
        grid_spec=pltpu.PrefetchScalarGridSpec(
            num_scalar_prefetch=0,
            grid=grid,
            in_specs=[
                pl.BlockSpec((tb, n_pad, d_in), lambda i: (i, 0, 0)),  # x tile
                pl.BlockSpec((d_in, d_pad), lambda i: (0, 0)),         # shared W
            ],
            out_specs=pl.BlockSpec((tb, d_pad), lambda i: (i, 0)),
        ),
        compiler_params=pltpu.CompilerParams(
            dimension_semantics=("parallel",),
            vmem_limit_bytes=vmem_limit,
        ),
        cost_estimate=cost,
    )(x_p, w_p)

    return out[:, :d_out]


def dynamic_routing_reference(x, W):
    """Pure-JAX transcription of the PyTorch forward (same math, no Gram trick)."""
    if W.ndim == 3:
        W = W[0]
    rep = jnp.einsum("bnd,do->bno", x, W)
    r_sum = jnp.sum(rep, axis=-1, keepdims=True)
    label = r_sum == 0.0
    b = jnp.where(label, -jnp.inf, 0.0)
    rep_norm = jnp.sqrt(jnp.sum(rep * rep, axis=-1, keepdims=True))
    rg = None
    for _ in range(_NUM_ITERS):
        m = jnp.max(b, axis=1, keepdims=True)
        e = jnp.exp(b - m)
        c = e / jnp.sum(e, axis=1, keepdims=True)
        rg = jnp.sum(c * rep, axis=1, keepdims=True)
        dots = jnp.sum(rep * rg, axis=-1, keepdims=True)
        rg_norm = jnp.sqrt(jnp.sum(rg * rg, axis=-1, keepdims=True))
        denom = jnp.maximum(rep_norm, _EPS) * jnp.maximum(rg_norm, _EPS)
        sim = dots / denom
        b = jnp.where(label, -jnp.inf, sim)
    return rg[:, 0, :]


if __name__ == "__main__":
    # Small shapes consistent with the module: batch=4, num_nodes=8,
    # in_dim=16, out_dim=32.  W ~ randn like the torch Parameter.
    B, N, IN_DIM, OUT_DIM = 4, 8, 16, 32

    key = jax.random.PRNGKey(0)
    kx, kw = jax.random.split(key)
    x = jax.random.normal(kx, (B, N, IN_DIM), jnp.float32)
    W = jax.random.normal(kw, (1, IN_DIM, OUT_DIM), jnp.float32)  # torch layout

    y = jax.block_until_ready(dynamic_routing_forward(x, W))
    y_ref = dynamic_routing_reference(x, W)

    assert y.shape == (B, OUT_DIM)
    # Tolerance covers MXU accumulation order and the EUP approx reciprocal;
    # routing-logic bugs produce O(0.1-1) errors and would still fail.
    assert jnp.allclose(y, y_ref, atol=2e-2, rtol=2e-2), "mismatch vs reference"

    print("KERNEL_OK")
</pallas_src>

<mosaic_0001>
module attributes {stable_mosaic.version = 11 : i64} {
  func.func @dynamic_routing_kernel(%arg0: i32, %arg1: memref<4x8x16xf32, #tpu.memory_space<vmem>>, %arg2: memref<16x128xf32, #tpu.memory_space<vmem>>, %arg3: memref<4x128xf32, #tpu.memory_space<vmem>>) attributes {dimension_semantics = [#tpu.dimension_semantics<parallel>], iteration_bounds = array<i64: 1>, scalar_prefetch = 0 : i64, scratch_operands = 0 : i64, tpu.core_type = #tpu.core_type<tc>, window_params = [{transform_indices = @transform_0, window_bounds = array<i64: 4, 8, 16>}, {pipeline_mode = #tpu.pipeline_mode<synchronous>, transform_indices = @transform_1, window_bounds = array<i64: 16, 128>}, {transform_indices = @transform_2, window_bounds = array<i64: 4, 128>}]} {
    %c0 = arith.constant 0 : index
    %c0_0 = arith.constant 0 : index
    %c0_1 = arith.constant 0 : index
    %0 = vector.load %arg1[%c0, %c0_0, %c0_1] : memref<4x8x16xf32, #tpu.memory_space<vmem>>, vector<4x8x16xf32>
    %c0_2 = arith.constant 0 : index
    %c0_3 = arith.constant 0 : index
    %1 = vector.load %arg2[%c0_2, %c0_3] : memref<16x128xf32, #tpu.memory_space<vmem>>, vector<16x128xf32>
    %2 = vector.shape_cast %0 : vector<4x8x16xf32> to vector<32x16xf32>
    %cst = arith.constant dense<0.000000e+00> : vector<32x128xf32>
    %3 = tpu.matmul %2, %1, %cst {dimension_numbers = #tpu.dot_dimension_numbers<[1], [0], [0], [1], [0, 0, 1, 1], [], []>} : vector<32x16xf32>, vector<16x128xf32>, vector<32x128xf32> -> vector<32x128xf32>
    %4 = vector.shape_cast %3 : vector<32x128xf32> to vector<4x8x128xf32>
    %cst_4 = arith.constant dense<0.000000e+00> : vector<4x8xf32>
    %5 = vector.multi_reduction <add>, %4, %cst_4 [2] : vector<4x8x128xf32> to vector<4x8xf32>
    %cst_5 = arith.constant 0.000000e+00 : f32
    %6 = vector.broadcast %cst_5 : f32 to vector<4x8xf32>
    %7 = arith.cmpf oeq, %5, %6 : vector<4x8xf32>
    %cst_6 = arith.constant dense<0.000000e+00> : vector<4x8x8xf32>
    %8 = tpu.matmul %4, %4, %cst_6 {dimension_numbers = #tpu.dot_dimension_numbers<[2], [2], [1], [1], [0, 0, 0, 1, 1, 1], [0], [0]>} : vector<4x8x128xf32>, vector<4x8x128xf32>, vector<4x8x8xf32> -> vector<4x8x8xf32>
    %9 = tpu.iota {dimensions = array<i32: 0>} : vector<8x8xi32>
    %10 = tpu.iota {dimensions = array<i32: 1>} : vector<8x8xi32>
    %11 = arith.cmpi eq, %9, %10 : vector<8x8xi32>
    %12 = vector.shape_cast %11 : vector<8x8xi1> to vector<1x8x8xi1>
    %cst_7 = arith.constant 0.000000e+00 : f32
    %13 = vector.shape_cast %12 : vector<1x8x8xi1> to vector<1x8x8xi1>
    %14 = vector.broadcast %13 : vector<1x8x8xi1> to vector<4x8x8xi1>
    %15 = vector.broadcast %cst_7 : f32 to vector<4x8x8xf32>
    %16 = arith.select %14, %8, %15 : vector<4x8x8xi1>, vector<4x8x8xf32>
    %cst_8 = arith.constant dense<0.000000e+00> : vector<4x8xf32>
    %17 = vector.multi_reduction <add>, %16, %cst_8 [2] : vector<4x8x8xf32> to vector<4x8xf32>
    %18 = math.sqrt %17 : vector<4x8xf32>
    %cst_9 = arith.constant 9.99999993E-9 : f32
    %19 = vector.broadcast %cst_9 : f32 to vector<4x8xf32>
    %20 = arith.maximumf %18, %19 : vector<4x8xf32>
    %cst_10 = arith.constant 0xFF800000 : f32
    %cst_11 = arith.constant 0.000000e+00 : f32
    %21 = vector.broadcast %cst_10 : f32 to vector<4x8xf32>
    %22 = vector.broadcast %cst_11 : f32 to vector<4x8xf32>
    %23 = arith.select %7, %21, %22 : vector<4x8xi1>, vector<4x8xf32>
    %cst_12 = arith.constant dense<0xFF800000> : vector<4xf32>
    %24 = vector.multi_reduction <maximumf>, %23, %cst_12 [1] : vector<4x8xf32> to vector<4xf32>
    %25 = vector.shape_cast %24 : vector<4xf32> to vector<4x1xf32>
    %26 = vector.broadcast %25 : vector<4x1xf32> to vector<4x8xf32>
    %27 = arith.subf %23, %26 : vector<4x8xf32>
    %28 = math.exp %27 : vector<4x8xf32>
    %cst_13 = arith.constant dense<0.000000e+00> : vector<4xf32>
    %29 = vector.multi_reduction <add>, %28, %cst_13 [1] : vector<4x8xf32> to vector<4xf32>
    %30 = vector.shape_cast %29 : vector<4xf32> to vector<4x1xf32>
    %31 = tpu.reciprocal %30 {approx = true} : vector<4x1xf32> -> vector<4x1xf32>
    %32 = vector.broadcast %31 : vector<4x1xf32> to vector<4x8xf32>
    %33 = arith.mulf %28, %32 : vector<4x8xf32>
    %34 = vector.shape_cast %33 : vector<4x8xf32> to vector<4x1x8xf32>
    %35 = vector.broadcast %34 : vector<4x1x8xf32> to vector<4x8x8xf32>
    %36 = arith.mulf %8, %35 : vector<4x8x8xf32>
    %cst_14 = arith.constant dense<0.000000e+00> : vector<4x8xf32>
    %37 = vector.multi_reduction <add>, %36, %cst_14 [2] : vector<4x8x8xf32> to vector<4x8xf32>
    %38 = arith.mulf %33, %37 : vector<4x8xf32>
    %cst_15 = arith.constant dense<0.000000e+00> : vector<4xf32>
    %39 = vector.multi_reduction <add>, %38, %cst_15 [1] : vector<4x8xf32> to vector<4xf32>
    %40 = vector.shape_cast %39 : vector<4xf32> to vector<4x1xf32>
    %cst_16 = arith.constant 0.000000e+00 : f32
    %41 = vector.broadcast %cst_16 : f32 to vector<4x1xf32>
    %42 = arith.maximumf %40, %41 : vector<4x1xf32>
    %43 = math.sqrt %42 : vector<4x1xf32>
    %cst_17 = arith.constant 9.99999993E-9 : f32
    %44 = vector.broadcast %cst_17 : f32 to vector<4x1xf32>
    %45 = arith.maximumf %43, %44 : vector<4x1xf32>
    %46 = vector.broadcast %45 : vector<4x1xf32> to vector<4x8xf32>
    %47 = arith.mulf %20, %46 : vector<4x8xf32>
    %48 = tpu.reciprocal %47 {approx = true} : vector<4x8xf32> -> vector<4x8xf32>
    %49 = arith.mulf %37, %48 : vector<4x8xf32>
    %cst_18 = arith.constant 0xFF800000 : f32
    %50 = vector.broadcast %cst_18 : f32 to vector<4x8xf32>
    %51 = arith.select %7, %50, %49 : vector<4x8xi1>, vector<4x8xf32>
    %cst_19 = arith.constant dense<0xFF800000> : vector<4xf32>
    %52 = vector.multi_reduction <maximumf>, %51, %cst_19 [1] : vector<4x8xf32> to vector<4xf32>
    %53 = vector.shape_cast %52 : vector<4xf32> to vector<4x1xf32>
    %54 = vector.broadcast %53 : vector<4x1xf32> to vector<4x8xf32>
    %55 = arith.subf %51, %54 : vector<4x8xf32>
    %56 = math.exp %55 : vector<4x8xf32>
    %cst_20 = arith.constant dense<0.000000e+00> : vector<4xf32>
    %57 = vector.multi_reduction <add>, %56, %cst_20 [1] : vector<4x8xf32> to vector<4xf32>
    %58 = vector.shape_cast %57 : vector<4xf32> to vector<4x1xf32>
    %59 = tpu.reciprocal %58 {approx = true} : vector<4x1xf32> -> vector<4x1xf32>
    %60 = vector.broadcast %59 : vector<4x1xf32> to vector<4x8xf32>
    %61 = arith.mulf %56, %60 : vector<4x8xf32>
    %62 = vector.shape_cast %61 : vector<4x8xf32> to vector<4x1x8xf32>
    %63 = vector.broadcast %62 : vector<4x1x8xf32> to vector<4x8x8xf32>
    %64 = arith.mulf %8, %63 : vector<4x8x8xf32>
    %cst_21 = arith.constant dense<0.000000e+00> : vector<4x8xf32>
    %65 = vector.multi_reduction <add>, %64, %cst_21 [2] : vector<4x8x8xf32> to vector<4x8xf32>
    %66 = arith.mulf %61, %65 : vector<4x8xf32>
    %cst_22 = arith.constant dense<0.000000e+00> : vector<4xf32>
    %67 = vector.multi_reduction <add>, %66, %cst_22 [1] : vector<4x8xf32> to vector<4xf32>
    %68 = vector.shape_cast %67 : vector<4xf32> to vector<4x1xf32>
    %cst_23 = arith.constant 0.000000e+00 : f32
    %69 = vector.broadcast %cst_23 : f32 to vector<4x1xf32>
    %70 = arith.maximumf %68, %69 : vector<4x1xf32>
    %71 = math.sqrt %70 : vector<4x1xf32>
    %cst_24 = arith.constant 9.99999993E-9 : f32
    %72 = vector.broadcast %cst_24 : f32 to vector<4x1xf32>
    %73 = arith.maximumf %71, %72 : vector<4x1xf32>
    %74 = vector.broadcast %73 : vector<4x1xf32> to vector<4x8xf32>
    %75 = arith.mulf %20, %74 : vector<4x8xf32>
    %76 = tpu.reciprocal %75 {approx = true} : vector<4x8xf32> -> vector<4x8xf32>
    %77 = arith.mulf %65, %76 : vector<4x8xf32>
    %cst_25 = arith.constant 0xFF800000 : f32
    %78 = vector.broadcast %cst_25 : f32 to vector<4x8xf32>
    %79 = arith.select %7, %78, %77 : vector<4x8xi1>, vector<4x8xf32>
    %cst_26 = arith.constant dense<0xFF800000> : vector<4xf32>
    %80 = vector.multi_reduction <maximumf>, %79, %cst_26 [1] : vector<4x8xf32> to vector<4xf32>
    %81 = vector.shape_cast %80 : vector<4xf32> to vector<4x1xf32>
    %82 = vector.broadcast %81 : vector<4x1xf32> to vector<4x8xf32>
    %83 = arith.subf %79, %82 : vector<4x8xf32>
    %84 = math.exp %83 : vector<4x8xf32>
    %cst_27 = arith.constant dense<0.000000e+00> : vector<4xf32>
    %85 = vector.multi_reduction <add>, %84, %cst_27 [1] : vector<4x8xf32> to vector<4xf32>
    %86 = vector.shape_cast %85 : vector<4xf32> to vector<4x1xf32>
    %87 = tpu.reciprocal %86 {approx = true} : vector<4x1xf32> -> vector<4x1xf32>
    %88 = vector.broadcast %87 : vector<4x1xf32> to vector<4x8xf32>
    %89 = arith.mulf %84, %88 : vector<4x8xf32>
    %90 = vector.shape_cast %89 : vector<4x8xf32> to vector<4x8x1xf32>
    %91 = vector.broadcast %90 : vector<4x8x1xf32> to vector<4x8x128xf32>
    %92 = arith.mulf %91, %4 : vector<4x8x128xf32>
    %cst_28 = arith.constant dense<0.000000e+00> : vector<4x128xf32>
    %93 = vector.multi_reduction <add>, %92, %cst_28 [1] : vector<4x8x128xf32> to vector<4x128xf32>
    %c0_29 = arith.constant 0 : index
    %c0_30 = arith.constant 0 : index
    %94 = vector.load %arg3[%c0_29, %c0_30] : memref<4x128xf32, #tpu.memory_space<vmem>>, vector<4x128xf32>
    tpu.vector_store %arg3[%c0_29, %c0_30], %93 {strides = array<i32>} : memref<4x128xf32, #tpu.memory_space<vmem>>, vector<4x128xf32>,
    return
  }
  func.func @transform_0(%arg0: i32) -> (i32, i32, i32) {
    %c0_i32 = arith.constant 0 : i32
    %c0_i32_0 = arith.constant 0 : i32
    %c0_i32_1 = arith.constant 0 : i32
    return %arg0, %c0_i32, %c0_i32_0 : i32, i32, i32
  }
  func.func @transform_1(%arg0: i32) -> (i32, i32) {
    %c0_i32 = arith.constant 0 : i32
    %c0_i32_0 = arith.constant 0 : i32
    %c0_i32_1 = arith.constant 0 : i32
    return %c0_i32, %c0_i32_0 : i32, i32
  }
  func.func @transform_2(%arg0: i32) -> (i32, i32) {
    %c0_i32 = arith.constant 0 : i32
    %c0_i32_0 = arith.constant 0 : i32
    return %arg0, %c0_i32 : i32, i32
  }
}

</mosaic_0001>

<bundles_post_ra>
// kernel: tpu_custom_call.1
= control target key start
LH: loop header
LB: loop body
LE: loop exit
PB: predicated region body
PF: predicated region fallthrough
CT: control target
= control target key end

     0   :  { %7 = vsyncpa [#allocation3], 0  ;;  %s1801_s0 = inlined_call_operand.hbm [shape: f32[4,8,16], index: 0, kind: input, shape index: {}]   ;;  %s1802_s1 = inlined_call_operand.hbm [shape: f32[16,128], index: 1, kind: input, shape index: {}]   ;;  %s1803_s2 = inlined_call_operand.hbm [shape: f32[4,128], index: 2, kind: output, shape index: {}]  }
   0x1   :  { %8 = vsyncpa [#allocation6], 0 }
   0x2   :  { %9 = vsyncpa [#allocation4], 0  ;;  %s1488_s9 = smov [#allocation2]  }
   0x3   :  { %s15_s10 = sshll.u32 %s1488_s9, 4  ;;  %s16_s10 = int_to_ptr.vmem [resolvable:$true] %s15_s10 }
   0x4   :  { %s1430_s11 = scalar_lea.vmem %s16_s10, 512  ;;  %p1435_p1 = scmp.lt.s32.totalorder %s16_s10, %s16_s10 }
   0x5   :  { %p1431_p0 = scmp.ne.s32.totalorder %s16_s10, %s1430_s11  ;;  %p1436_p2 = scmp.lt.s32.totalorder %s1430_s11, %s1430_s11 }
   0x7   :  { %p1437_p3 = por %p1436_p2, %p1435_p1 }
   0x9   :  { %p1438_p4 = pnand %p1437_p3, %p1431_p0 }
   0xb   :  { %1441 = shalt.err (!%p1438_p4)
}
   0xc   :  { %s1489_s12 = smov 128   ;;  %s1490_s13 = smov 8  }
   0xd   :  { %21 = dma.hbm_to_vmem [thread:$0]  %s1801_s0, 512, %s16_s10, [#allocation3], %s1489_s12, %s1489_s12, %s1490_s13  }
   0xe   :  { %s1491_s16 = smov [#allocation5]  }
   0xf   :  { %s27_s17 = sshll.u32 %s1491_s16, 4  ;;  %s28_s17 = int_to_ptr.vmem [resolvable:$true] %s27_s17 }
  0x10   :  { %s1450_s18 = scalar_lea.vmem %s28_s17, 256  ;;  %p1455_p6 = scmp.lt.s32.totalorder %s28_s17, %s28_s17 }
  0x11   :  { %p1451_p5 = scmp.ne.s32.totalorder %s28_s17, %s1450_s18  ;;  %p1456_p7 = scmp.lt.s32.totalorder %s1450_s18, %s1450_s18 }
  0x13   :  { %p1457_p8 = por %p1456_p7, %p1455_p6 }
  0x15   :  { %p1458_p9 = pnand %p1457_p8, %p1451_p5 }
  0x17   :  { %1461 = shalt.err (!%p1458_p9)
}
  0x18   :  { %33 = dma.hbm_to_vmem [thread:$0]  %s1802_s1, 256, %s28_s17, [#allocation6], %s1489_s12, %s1489_s12, %s1490_s13  }
  0x19   :  { %1482 = dma.done.wait [#allocation3], 512  }
  0x1a   :  { %1483 = vsyncadd [#allocation3], 4294966784 }
  0x1b   :  { %1484 = dma.done.wait [#allocation6], 256  }
  0x1c   :  { %1485 = vsyncadd [#allocation6], 4294967040  ;;  %vm46_vm0 = vcmask 130048   ;;  %v45_v0 = vld [vmem:[#allocation5 + $0x8] sm:$0xff]  ;;  %v44_v1 = vld [vmem:[#allocation5] sm:$0xff]  ;;  %v1492_v6 = vmov 0.0   ;;  %v436_v11 = vlaneseq }
  0x1d   :  { %v40_v2 = vld [vmem:[#allocation2] sm:$0xff]  ;;  %1324 = vmatprep.subr.mxu0 %v45_v0  ;;  %v41_v3 = vld [vmem:[#allocation2 + $0x8] sm:$0xff]  ;;  %v42_v4 = vld [vmem:[#allocation2 + $0x10] sm:$0xff]  ;;  %1334 = vmatprep.subr.mxu1 %v1492_v6  ;;  %vm1493_vm1 = vmmov 0   ;;  %vm516_vm5 = vcmask 1041409   ;;  %vm518_vm7 = vcmask 1042434  }
  0x1e   :  { %1328 = vmatprep.mubr.msk.f32.mxu0 %vm46_vm0, %v40_v2  ;;  %1325 = vmatpush3.msra.mxu0 %v45_v0  ;;  %v43_v5 = vld [vmem:[#allocation2 + $0x18] sm:$0xff]  ;;  %v1541_v12 = vshrl.u32 %v436_v11, 7  ;;  %v1543_v13 = vand.u32 127, %v436_v11  ;;  %vm520_vm8 = vcmask 1043459   ;;  %vm523_vm9 = vcmask 60416   ;;  %s1495_s0 = smov [#allocation7]  }
  0x1f   :  { %1326 = vmatprep.subr.mxu0 %v44_v1  ;;  %1336 = vmatprep.mubr.msk.f32.mxu1 %vm1493_vm1, %v1492_v6  ;;  %v1494_v31 = vmov 0   ;;  %vm447_vm10 = vcmask 64512   ;;  %s1296_s1 = sshll.u32 %s1495_s0, 4  ;;  %s1297_s1 = int_to_ptr.vmem [resolvable:$true] %s1296_s1 }
  0x20   :  { %1327 = vmatpush3.msra.mxu0 %v44_v1  ;;  %v1550_v15 = vsub.s32 %v1543_v13, %v1541_v12  ;;  %1363 = vset.pattern.permute.xlu0 %v1494_v31  ;;  %v1586_v40 = vsub.s32 0, %v1541_v12  ;;  %v1589_v41 = vsub.s32 1, %v1541_v12  ;;  %v1592_v42 = vsub.s32 2, %v1541_v12  ;;  %s1462_s21 = scalar_lea.vmem %s1297_s1, 64  ;;  %p1467_p11 = scmp.lt.s32.totalorder %s1297_s1, %s1297_s1 }
  0x21   :  { %1329 = vmatmul.mubr.msk.f32.vlgmr.msra.gmra.mxu0 %vm46_vm0, %v41_v3  ;;  %1344 = vmatprep.subr.mxu0 %v1492_v6  ;;  %v1595_v43 = vsub.s32 3, %v1541_v12  ;;  %vm440_vm11 = vcmp.eq.s32.totalorder %v1541_v12, %v1543_v13  ;;  %p1463_p10 = scmp.ne.s32.totalorder %s1297_s1, %s1462_s21  ;;  %p1468_p12 = scmp.lt.s32.totalorder %s1462_s21, %s1462_s21 }
  0x22   :  { %1331 = vmatprep.mubr.msk.f32.mxu0 %vm46_vm0, %v42_v4  ;;  %1362 = vset.pattern.permute.xlu1 %v1494_v31 }
  0x23   :  { %p1469_p13 = por %p1468_p12, %p1467_p11 }
  0x25   :  { %1332 = vmatmul.mubr.msk.f32.gmra.mxu0 %vm46_vm0, %v43_v5  ;;  %p1470_p0 = pnand %p1469_p13, %p1463_p10 }
  0x26   :  { %1346 = vmatprep.mubr.msk.f32.mxu0 %vm1493_vm1, %v1492_v6 }
  0xe1   :  { %v1519_v7 = vpop.f32.mrf.mxu0 }
  0xe3   :  { %v1521_v8 = vpop.f32.mrf.mxu0 }
  0xe4   :  { %144 = vadd.xlane.f32.xlu0 %v1521_v8  ;;  %1335 = vmatpush3.xpose.msra.mxu1 %v1521_v8 }
  0xe5   :  { %v1525_v9 = vpop.f32.mrf.mxu0  ;;  %1339 = vmatprep.subr.mxu1 %v1492_v6 }
  0xe7   :  { %v1527_v10 = vpop.f32.mrf.mxu0  ;;  %1337 = vmatmul.mubr.f32.vlgmr.msra.gmra.mxu1 %v1521_v8 }
  0xe8   :  { %146 = vadd.xlane.f32.xlu0 %v1519_v7  ;;  %1340 = vmatpush3.xpose.msra.mxu1 %v1519_v7 }
  0xe9   :  { %148 = vadd.xlane.f32.xlu1 %v1527_v10  ;;  %1345 = vmatpush3.xpose.msra.mxu0 %v1527_v10 }
  0xea   :  { %1341 = vmatprep.mubr.msk.f32.mxu1 %vm1493_vm1, %v1492_v6  ;;  %1349 = vmatprep.subr.mxu1 %v1492_v6 }
  0xeb   :  { %1342 = vmatmul.mubr.f32.vlgmr.msra.gmra.mxu1 %v1519_v7 }
  0xec   :  { %1347 = vmatmul.mubr.f32.vlgmr.msra.gmra.mxu0 %v1527_v10  ;;  %1350 = vmatpush3.xpose.msra.mxu1 %v1525_v9 }
  0xed   :  { %150 = vadd.xlane.f32.xlu1 %v1525_v9  ;;  %1351 = vmatprep.mubr.msk.f32.mxu1 %vm1493_vm1, %v1492_v6 }
  0xef   :  { %1352 = vmatmul.mubr.f32.vlgmr.msra.gmra.mxu1 %v1525_v9 }
 0x16d   :  { %v1545_v14 = vpop.xlane.xlu0 %144 }
 0x16e   :  { %vm152_vm2 = vcmp.eq.f32.partialorder %v1545_v14, 0.0 }
 0x16f   :  { %v492_v17 = vsel %vm152_vm2, -inf, %v1492_v6 }
 0x170   :  { %v503_v22 = vrot.slane %v492_v17, %v1550_v15 }
 0x171   :  { %v1552_v16 = vpop.xlane.xlu0 %146 }
 0x172   :  { %vm153_vm3 = vcmp.eq.f32.partialorder %v1552_v16, 0.0  ;;  %v1557_v18 = vpop.xlane.xlu1 %148 }
 0x173   :  { %v493_v19 = vsel %vm153_vm3, -inf, %v1492_v6  ;;  %vm154_vm4 = vcmp.eq.f32.partialorder %v1557_v18, 0.0 }
 0x174   :  { %v507_v20 = vrot.slane %v493_v19, %v1550_v15  ;;  %v494_v21 = vsel %vm154_vm4, -inf, %v1492_v6 }
 0x175   :  { %v511_v23 = vrot.slane %v494_v21, %v1550_v15 }
 0x176   :  { %v1567_v24 = vpop.xlane.xlu1 %150  ;;  %v517_v25 = vsel %vm516_vm5, %v507_v20, %v503_v22 }
 0x177   :  { %vm155_vm6 = vcmp.eq.f32.partialorder %v1567_v24, 0.0  ;;  %v519_v28 = vsel %vm518_vm7, %v511_v23, %v517_v25 }
 0x178   :  { %v495_v26 = vsel %vm155_vm6, -inf, %v1492_v6 }
 0x179   :  { %v515_v27 = vrot.slane %v495_v26, %v1550_v15 }
 0x17b   :  { %v521_v29 = vsel %vm520_vm8, %v515_v27, %v519_v28 }
 0x17c   :  { %v524_v30 = vsel %vm523_vm9, %v521_v29, -inf }
 0x17d   :  { %525 = vmax.xlane.f32.xlu0 %v524_v30 }
 0x1a7   :  { %v1577_v32 = vpop.f32.mrf.mxu1 }
 0x1a9   :  { %v1338_v33 = vpop.f32.mrf.mxu1 }
 0x1ab   :  { %v1579_v34 = vpop.f32.mrf.mxu1 }
 0x1ac   :  { %v1581_v35 = vpop.f32.mrf.mxu0 }
 0x1ad   :  { %v1343_v36 = vpop.f32.mrf.mxu1 }
 0x1ae   :  { %v1348_v37 = vpop.f32.mrf.mxu0 }
 0x1af   :  { %v1583_v38 = vpop.f32.mrf.mxu1 }
 0x1b1   :  { %v1353_v39 = vpop.f32.mrf.mxu1 }
 0x206   :  { %v526_v44 = vpop.xlane.xlu0 %525 }
 0x207   :  { %v531_v45 = vrot.slane %v526_v44, %v1586_v40  ;;  %v535_v46 = vrot.slane %v526_v44, %v1589_v41  ;;  %v539_v47 = vrot.slane %v526_v44, %v1592_v42  ;;  %v543_v48 = vrot.slane %v526_v44, %v1595_v43 }
 0x209   :  { %v548_v49 = vsub.f32 %v492_v17, %v531_v45  ;;  %v549_v50 = vsub.f32 %v493_v19, %v535_v46  ;;  %v550_v51 = vsub.f32 %v494_v21, %v539_v47  ;;  %v551_v54 = vsub.f32 %v495_v26, %v543_v48 }
 0x20b   :  { %v552_v52 = vmul.f32 1.442695, %v548_v49  ;;  %v554_v53 = vmul.f32 1.442695, %v549_v50  ;;  %v556_v55 = vmul.f32 1.442695, %v550_v51 }
 0x20c   :  { %v558_v56 = vmul.f32 1.442695, %v551_v54 }
 0x20d   :  { %1364 = vpow2.f32 %v552_v52 }
 0x20e   :  { %1366 = vpow2.f32 %v554_v53 }
 0x20f   :  { %1368 = vpow2.f32 %v556_v55 }
 0x210   :  { %1370 = vpow2.f32 %v558_v56 }
 0x21a   :  { %v1365_v57 = vpop.eup %1364 }
 0x21b   :  { %v1367_v58 = vpop.eup %1366  ;;  %565 = vperm.xlu1 %1362, %v1365_v57  }
 0x21c   :  { %568 = vperm.xlu0 %1363, %v1367_v58   ;;  %v1369_v59 = vpop.eup %1368 }
 0x21d   :  { %v1371_v60 = vpop.eup %1370 }
 0x21f   :  { %571 = vperm.xlu1 %1362, %v1369_v59  }
 0x223   :  { %574 = vperm.xlu1 %1362, %v1371_v60  }
 0x296   :  { %v566_v61 = vpop.permute.xlu1 %565 }
 0x297   :  { %v569_v62 = vpop.permute.xlu0 %568  ;;  %v579_v1 = vrot.slane %v566_v61, %v1550_v15 }
 0x298   :  { %v583_v0 = vrot.slane %v569_v62, %v1550_v15  ;;  %v443_v62 = vsel %vm440_vm11, %v1577_v32, 0.0 }
 0x29a   :  { %v572_v63 = vpop.permute.xlu1 %571  ;;  %v592_v4 = vsel %vm516_vm5, %v583_v0, %v579_v1  ;;  %v448_v0 = vsel %vm447_vm10, %v443_v62, 0.0 }
 0x29b   :  { %v587_v2 = vrot.slane %v572_v63, %v1550_v15  ;;  %v444_v63 = vsel %vm440_vm11, %v1579_v34, 0.0 }
 0x29c   :  { %v451_v1 = vsel %vm447_vm10, %v444_v63, 0.0 }
 0x29d   :  { %v593_v6 = vsel %vm518_vm7, %v587_v2, %v592_v4 }
 0x29e   :  { %v575_v3 = vpop.permute.xlu1 %574 }
 0x29f   :  { %v591_v5 = vrot.slane %v575_v3, %v1550_v15 }
 0x2a1   :  { %v594_v11 = vsel %vm520_vm8, %v591_v5, %v593_v6 }
 0x2a2   :  { %v596_v17 = vsel %vm523_vm9, %v594_v11, 0.0 }
 0x2a3   :  { %597 = vadd.xlane.f32.xlu1 %v596_v17 }
 0x32c   :  { %v598_v19 = vpop.xlane.xlu1 %597 }
 0x32d   :  { %1372 = vrcp.f32 %v598_v19 }
 0x33a   :  { %v1373_v20 = vpop.eup %1372 }
 0x33b   :  { %v604_v21 = vrot.slane %v1373_v20, %v1586_v40  ;;  %v608_v23 = vrot.slane %v1373_v20, %v1589_v41  ;;  %v612_v26 = vrot.slane %v1373_v20, %v1592_v42  ;;  %v616_v28 = vrot.slane %v1373_v20, %v1595_v43 }
 0x33d   :  { %v621_v22 = vmul.f32 %v1365_v57, %v604_v21  ;;  %v622_v25 = vmul.f32 %v1367_v58, %v608_v23  ;;  %v623_v27 = vmul.f32 %v1369_v59, %v612_v26  ;;  %v624_v29 = vmul.f32 %v1371_v60, %v616_v28 }
 0x33f   :  { %630 = vperm.xlu0 %1363, %v621_v22  }
 0x343   :  { %633 = vperm.xlu0 %1363, %v622_v25  }
 0x347   :  { %636 = vperm.xlu0 %1363, %v623_v27  }
 0x34b   :  { %639 = vperm.xlu0 %1363, %v624_v29  }
 0x3ba   :  { %v631_v30 = vpop.permute.xlu0 %630 }
 0x3bb   :  { %v644_v31 = vrot.slane %v631_v30, %v1550_v15 }
 0x3bd   :  { %v689_v33 = vmul.f32 %v644_v31, %v1577_v32 }
 0x3be   :  { %v634_v36 = vpop.permute.xlu0 %633 }
 0x3bf   :  { %v648_v37 = vrot.slane %v634_v36, %v1550_v15  ;;  %v693_v39 = vsel %vm447_vm10, %v689_v33, 0.0 }
 0x3c0   :  { %694 = vadd.xlane.f32.xlu1 %v693_v39 }
 0x3c1   :  { %v690_v44 = vmul.f32 %v648_v37, %v1579_v34 }
 0x3c2   :  { %v637_v45 = vpop.permute.xlu0 %636 }
 0x3c3   :  { %v652_v46 = vrot.slane %v637_v45, %v1550_v15  ;;  %v696_v47 = vsel %vm447_vm10, %v690_v44, 0.0 }
 0x3c4   :  { %697 = vadd.xlane.f32.xlu0 %v696_v47 }
 0x3c5   :  { %v691_v48 = vmul.f32 %v652_v46, %v1581_v35 }
 0x3c6   :  { %v640_v49 = vpop.permute.xlu0 %639 }
 0x3c7   :  { %v656_v50 = vrot.slane %v640_v49, %v1550_v15  ;;  %v699_v51 = vsel %vm447_vm10, %v691_v48, 0.0 }
 0x3c8   :  { %700 = vadd.xlane.f32.xlu1 %v699_v51 }
 0x3c9   :  { %v692_v52 = vmul.f32 %v656_v50, %v1583_v38 }
 0x3cb   :  { %v702_v53 = vsel %vm447_vm10, %v692_v52, 0.0 }
 0x3cc   :  { %703 = vadd.xlane.f32.xlu1 %v702_v53 }
 0x449   :  { %v1625_v54 = vpop.xlane.xlu1 %694 }
 0x44a   :  { %v705_v55 = vmul.f32 %v1625_v54, %v621_v22 }
 0x44c   :  { %714 = vperm.xlu1 %1362, %v705_v55  }
 0x44d   :  { %v1628_v56 = vpop.xlane.xlu0 %697 }
 0x44e   :  { %v706_v57 = vmul.f32 %v1628_v56, %v622_v25  ;;  %v445_v25 = vsel %vm440_vm11, %v1581_v35, 0.0 }
 0x44f   :  { %v454_v26 = vsel %vm447_vm10, %v445_v25, 0.0 }
 0x450   :  { %717 = vperm.xlu1 %1362, %v706_v57  }
 0x451   :  { %v1631_v58 = vpop.xlane.xlu1 %700 }
 0x452   :  { %v707_v59 = vmul.f32 %v1631_v58, %v623_v27  ;;  %v446_v27 = vsel %vm440_vm11, %v1583_v38, 0.0 }
 0x453   :  { %v457_v28 = vsel %vm447_vm10, %v446_v27, 0.0 }
 0x454   :  { %720 = vperm.xlu1 %1362, %v707_v59  }
 0x455   :  { %v1634_v60 = vpop.xlane.xlu1 %703 }
 0x456   :  { %v708_v61 = vmul.f32 %v1634_v60, %v624_v29 }
 0x458   :  { %723 = vperm.xlu0 %1363, %v708_v61  }
 0x477   :  { %449 = vadd.xlane.f32.xlu0 %v448_v0 }
 0x478   :  { %452 = vadd.xlane.f32.xlu1 %v451_v1 }
 0x4c7   :  { %v715_v2 = vpop.permute.xlu1 %714 }
 0x4c8   :  { %v728_v11 = vrot.slane %v715_v2, %v1550_v15 }
 0x4cb   :  { %v718_v3 = vpop.permute.xlu1 %717 }
 0x4cc   :  { %v732_v5 = vrot.slane %v718_v3, %v1550_v15 }
 0x4ce   :  { %v741_v19 = vsel %vm516_vm5, %v732_v5, %v728_v11 }
 0x4cf   :  { %v721_v4 = vpop.permute.xlu1 %720 }
 0x4d0   :  { %v736_v6 = vrot.slane %v721_v4, %v1550_v15 }
 0x4d2   :  { %v742_v21 = vsel %vm518_vm7, %v736_v6, %v741_v19 }
 0x4d3   :  { %v724_v17 = vpop.permute.xlu0 %723 }
 0x4d4   :  { %v740_v20 = vrot.slane %v724_v17, %v1550_v15 }
 0x4d6   :  { %v743_v22 = vsel %vm520_vm8, %v740_v20, %v742_v21 }
 0x4d7   :  { %v745_v23 = vsel %vm523_vm9, %v743_v22, 0.0 }
 0x4d8   :  { %746 = vadd.xlane.f32.xlu1 %v745_v23 }
 0x4dc   :  { %455 = vadd.xlane.f32.xlu1 %v454_v26 }
 0x4e0   :  { %458 = vadd.xlane.f32.xlu1 %v457_v28 }
 0x500   :  { %v450_v29 = vpop.xlane.xlu0 %449 }
 0x501   :  { %v453_v30 = vpop.xlane.xlu1 %452  ;;  %1374 = vrsqrt.f32 %v450_v29  ;;  %vm462_vm12 = vcmp.eq.f32.partialorder %v450_v29, inf  ;;  %vm464_vm14 = vcmp.eq.f32.partialorder %v450_v29, 0.0  ;;  %v465_v47 = vand.u32 2147483648, %v450_v29 }
 0x502   :  { %1376 = vrsqrt.f32 %v453_v30  ;;  %vm469_vm13 = vcmp.eq.f32.partialorder %v453_v30, inf  ;;  %vm471_vm15 = vcmp.eq.f32.partialorder %v453_v30, 0.0  ;;  %v472_v51 = vand.u32 2147483648, %v453_v30 }
 0x50e   :  { %v1375_v39 = vpop.eup %1374 }
 0x50f   :  { %v1377_v44 = vpop.eup %1376  ;;  %v461_v45 = vmul.f32 %v1375_v39, %v450_v29 }
 0x510   :  { %v468_v46 = vmul.f32 %v1377_v44, %v453_v30 }
 0x511   :  { %v463_v13 = vsel %vm462_vm12, %v450_v29, %v461_v45 }
 0x512   :  { %v470_v48 = vsel %vm469_vm13, %v453_v30, %v468_v46  ;;  %v1667_v53 = vsel %vm464_vm14, %v465_v47, %v463_v13 }
 0x513   :  { %v1669_v59 = vsel %vm471_vm15, %v472_v51, %v470_v48  ;;  %v488_v2 = vmax.f32 %v1667_v53, 1e-08 }
 0x514   :  { %v489_v4 = vmax.f32 %v1669_v59, 1e-08 }
 0x561   :  { %v747_v31 = vpop.xlane.xlu1 %746 }
 0x562   :  { %v748_v33 = vmax.f32 %v747_v31, 0.0 }
 0x564   :  { %1378 = vrsqrt.f32 %v748_v33  ;;  %vm751_vm0 = vcmp.eq.f32.partialorder %v748_v33, inf  ;;  %v754_v52 = vand.u32 2147483648, %v748_v33  ;;  %vm753_vm1 = vcmp.eq.f32.partialorder %v748_v33, 0.0 }
 0x565   :  { %v456_v36 = vpop.xlane.xlu1 %455 }
 0x566   :  { %1380 = vrsqrt.f32 %v456_v36  ;;  %vm476_vm11 = vcmp.eq.f32.partialorder %v456_v36, inf  ;;  %v479_v62 = vand.u32 2147483648, %v456_v36  ;;  %vm478_vm12 = vcmp.eq.f32.partialorder %v456_v36, 0.0 }
 0x569   :  { %v459_v37 = vpop.xlane.xlu1 %458 }
 0x56a   :  { %1382 = vrsqrt.f32 %v459_v37  ;;  %vm483_vm13 = vcmp.eq.f32.partialorder %v459_v37, inf  ;;  %v486_v17 = vand.u32 2147483648, %v459_v37  ;;  %vm485_vm14 = vcmp.eq.f32.partialorder %v459_v37, 0.0 }
 0x571   :  { %v1379_v12 = vpop.eup %1378 }
 0x572   :  { %v750_v49 = vmul.f32 %v1379_v12, %v748_v33 }
 0x573   :  { %v1381_v50 = vpop.eup %1380 }
 0x574   :  { %v752_v55 = vsel %vm751_vm0, %v748_v33, %v750_v49  ;;  %v475_v57 = vmul.f32 %v1381_v50, %v456_v36 }
 0x575   :  { %v755_v61 = vsel %vm753_vm1, %v754_v52, %v752_v55 }
 0x576   :  { %v756_v63 = vmax.f32 %v755_v61, 1e-08  ;;  %v477_v0 = vsel %vm476_vm11, %v456_v36, %v475_v57 }
 0x577   :  { %v1383_v1 = vpop.eup %1382  ;;  %v1672_v3 = vsel %vm478_vm12, %v479_v62, %v477_v0 }
 0x578   :  { %v769_v5 = vrot.slane %v756_v63, %v1592_v42  ;;  %v490_v6 = vmax.f32 %v1672_v3, 1e-08  ;;  %v482_v11 = vmul.f32 %v1383_v1, %v459_v37  ;;  %v765_v19 = vrot.slane %v756_v63, %v1589_v41 }
 0x579   :  { %v761_v20 = vrot.slane %v756_v63, %v1586_v40  ;;  %v773_v27 = vrot.slane %v756_v63, %v1595_v43 }
 0x57a   :  { %v780_v21 = vmul.f32 %v769_v5, %v490_v6  ;;  %v484_v22 = vsel %vm483_vm13, %v459_v37, %v482_v11  ;;  %v779_v25 = vmul.f32 %v765_v19, %v489_v4 }
 0x57b   :  { %v1681_v23 = vsel %vm485_vm14, %v486_v17, %v484_v22  ;;  %v778_v26 = vmul.f32 %v761_v20, %v488_v2 }
 0x57c   :  { %1384 = vrcp.f32 %v780_v21  ;;  %v491_v28 = vmax.f32 %v1681_v23, 1e-08 }
 0x57d   :  { %1386 = vrcp.f32 %v779_v25 }
 0x57e   :  { %v781_v29 = vmul.f32 %v773_v27, %v491_v28  ;;  %1388 = vrcp.f32 %v778_v26 }
 0x580   :  { %1390 = vrcp.f32 %v781_v29 }
 0x589   :  { %v1385_v30 = vpop.eup %1384 }
 0x58a   :  { %v1387_v31 = vpop.eup %1386  ;;  %v788_v45 = vmul.f32 %v1385_v30, %v1631_v58 }
 0x58b   :  { %v1389_v33 = vpop.eup %1388  ;;  %v787_v36 = vmul.f32 %v1387_v31, %v1628_v56 }
 0x58c   :  { %v786_v37 = vmul.f32 %v1389_v33, %v1625_v54  ;;  %v792_v12 = vsel %vm154_vm4, -inf, %v788_v45 }
 0x58d   :  { %v791_v39 = vsel %vm153_vm3, -inf, %v787_v36  ;;  %v1391_v46 = vpop.eup %1390 }
 0x58e   :  { %802 = vperm.xlu0 %1363, %v791_v39   ;;  %v790_v44 = vsel %vm152_vm2, -inf, %v786_v37  ;;  %v789_v13 = vmul.f32 %v1391_v46, %v1634_v60 }
 0x58f   :  { %799 = vperm.xlu1 %1362, %v790_v44  }
 0x590   :  { %v793_v54 = vsel %vm155_vm6, -inf, %v789_v13 }
 0x593   :  { %805 = vperm.xlu1 %1362, %v792_v12  }
 0x597   :  { %808 = vperm.xlu1 %1362, %v793_v54  }
 0x609   :  { %v803_v47 = vpop.permute.xlu0 %802 }
 0x60a   :  { %v800_v56 = vpop.permute.xlu1 %799  ;;  %v817_v49 = vrot.slane %v803_v47, %v1550_v15 }
 0x60b   :  { %v813_v50 = vrot.slane %v800_v56, %v1550_v15 }
 0x60d   :  { %v826_v52 = vsel %vm516_vm5, %v817_v49, %v813_v50 }
 0x60e   :  { %v806_v48 = vpop.permute.xlu1 %805 }
 0x60f   :  { %v821_v58 = vrot.slane %v806_v48, %v1550_v15 }
 0x611   :  { %v827_v60 = vsel %vm518_vm7, %v821_v58, %v826_v52 }
 0x612   :  { %v809_v51 = vpop.permute.xlu1 %808 }
 0x613   :  { %v825_v55 = vrot.slane %v809_v51, %v1550_v15 }
 0x615   :  { %v828_v57 = vsel %vm520_vm8, %v825_v55, %v827_v60 }
 0x616   :  { %v830_v61 = vsel %vm523_vm9, %v828_v57, -inf }
 0x617   :  { %831 = vmax.xlane.f32.xlu0 %v830_v61 }
 0x6a0   :  { %v832_v62 = vpop.xlane.xlu0 %831 }
 0x6a1   :  { %v837_v63 = vrot.slane %v832_v62, %v1586_v40  ;;  %v841_v0 = vrot.slane %v832_v62, %v1589_v41  ;;  %v845_v1 = vrot.slane %v832_v62, %v1592_v42  ;;  %v849_v19 = vrot.slane %v832_v62, %v1595_v43 }
 0x6a3   :  { %v854_v5 = vsub.f32 %v790_v44, %v837_v63  ;;  %v855_v11 = vsub.f32 %v791_v39, %v841_v0  ;;  %v856_v20 = vsub.f32 %v792_v12, %v845_v1  ;;  %v857_v22 = vsub.f32 %v793_v54, %v849_v19 }
 0x6a5   :  { %v858_v17 = vmul.f32 1.442695, %v854_v5  ;;  %v860_v21 = vmul.f32 1.442695, %v855_v11  ;;  %v862_v25 = vmul.f32 1.442695, %v856_v20 }
 0x6a6   :  { %v864_v26 = vmul.f32 1.442695, %v857_v22 }
 0x6a7   :  { %1392 = vpow2.f32 %v858_v17 }
 0x6a8   :  { %1394 = vpow2.f32 %v860_v21 }
 0x6a9   :  { %1396 = vpow2.f32 %v862_v25 }
 0x6aa   :  { %1398 = vpow2.f32 %v864_v26 }
 0x6b4   :  { %v1393_v27 = vpop.eup %1392 }
 0x6b5   :  { %871 = vperm.xlu1 %1362, %v1393_v27   ;;  %v1395_v29 = vpop.eup %1394 }
 0x6b6   :  { %v1397_v30 = vpop.eup %1396 }
 0x6b7   :  { %v1399_v31 = vpop.eup %1398 }
 0x6b9   :  { %874 = vperm.xlu1 %1362, %v1395_v29  }
 0x6bd   :  { %877 = vperm.xlu1 %1362, %v1397_v30  }
 0x6c1   :  { %880 = vperm.xlu1 %1362, %v1399_v31  }
 0x730   :  { %v872_v33 = vpop.permute.xlu1 %871 }
 0x731   :  { %v885_v45 = vrot.slane %v872_v33, %v1550_v15 }
 0x734   :  { %v875_v36 = vpop.permute.xlu1 %874 }
 0x735   :  { %v889_v39 = vrot.slane %v875_v36, %v1550_v15 }
 0x737   :  { %v898_v12 = vsel %vm516_vm5, %v889_v39, %v885_v45 }
 0x738   :  { %v878_v37 = vpop.permute.xlu1 %877 }
 0x739   :  { %v893_v44 = vrot.slane %v878_v37, %v1550_v15 }
 0x73b   :  { %v899_v54 = vsel %vm518_vm7, %v893_v44, %v898_v12 }
 0x73c   :  { %v881_v46 = vpop.permute.xlu1 %880 }
 0x73d   :  { %v897_v13 = vrot.slane %v881_v46, %v1550_v15 }
 0x73f   :  { %v900_v56 = vsel %vm520_vm8, %v897_v13, %v899_v54 }
 0x740   :  { %v902_v47 = vsel %vm523_vm9, %v900_v56, 0.0 }
 0x741   :  { %903 = vadd.xlane.f32.xlu1 %v902_v47 }
 0x7ca   :  { %v904_v48 = vpop.xlane.xlu1 %903 }
 0x7cb   :  { %1400 = vrcp.f32 %v904_v48 }
 0x7d8   :  { %v1401_v49 = vpop.eup %1400 }
 0x7d9   :  { %v918_v50 = vrot.slane %v1401_v49, %v1592_v42  ;;  %v910_v58 = vrot.slane %v1401_v49, %v1586_v40  ;;  %v914_v55 = vrot.slane %v1401_v49, %v1589_v41  ;;  %v922_v57 = vrot.slane %v1401_v49, %v1595_v43 }
 0x7db   :  { %v929_v51 = vmul.f32 %v1397_v30, %v918_v50  ;;  %v927_v52 = vmul.f32 %v1393_v27, %v910_v58  ;;  %v928_v60 = vmul.f32 %v1395_v29, %v914_v55  ;;  %v930_v61 = vmul.f32 %v1399_v31, %v922_v57 }
 0x7dd   :  { %942 = vperm.xlu1 %1362, %v929_v51   ;;  %936 = vperm.xlu0 %1363, %v927_v52  }
 0x7e1   :  { %939 = vperm.xlu0 %1363, %v928_v60  }
 0x7e5   :  { %945 = vperm.xlu0 %1363, %v930_v61  }
 0x858   :  { %v943_v62 = vpop.permute.xlu1 %942  ;;  %v937_v63 = vpop.permute.xlu0 %936 }
 0x859   :  { %v958_v0 = vrot.slane %v943_v62, %v1550_v15  ;;  %v950_v1 = vrot.slane %v937_v63, %v1550_v15 }
 0x85b   :  { %v991_v5 = vmul.f32 %v950_v1, %v1577_v32  ;;  %v993_v20 = vmul.f32 %v958_v0, %v1581_v35 }
 0x85c   :  { %v940_v11 = vpop.permute.xlu0 %939 }
 0x85d   :  { %v954_v17 = vrot.slane %v940_v11, %v1550_v15  ;;  %v995_v19 = vsel %vm447_vm10, %v991_v5, 0.0  ;;  %v1001_v26 = vsel %vm447_vm10, %v993_v20, 0.0 }
 0x85e   :  { %996 = vadd.xlane.f32.xlu0 %v995_v19 }
 0x85f   :  { %v992_v21 = vmul.f32 %v954_v17, %v1579_v34 }
 0x860   :  { %v946_v22 = vpop.permute.xlu0 %945 }
 0x861   :  { %v962_v25 = vrot.slane %v946_v22, %v1550_v15  ;;  %v998_v27 = vsel %vm447_vm10, %v992_v21, 0.0 }
 0x862   :  { %1002 = vadd.xlane.f32.xlu0 %v1001_v26  ;;  %999 = vadd.xlane.f32.xlu1 %v998_v27 }
 0x863   :  { %v994_v32 = vmul.f32 %v962_v25, %v1583_v38 }
 0x865   :  { %v1004_v29 = vsel %vm447_vm10, %v994_v32, 0.0 }
 0x866   :  { %1005 = vadd.xlane.f32.xlu0 %v1004_v29 }
 0x8e7   :  { %v997_v30 = vpop.xlane.xlu0 %996 }
 0x8e8   :  { %v1007_v31 = vmul.f32 %v997_v30, %v927_v52 }
 0x8ea   :  { %1016 = vperm.xlu0 %1363, %v1007_v31  }
 0x8eb   :  { %v1000_v35 = vpop.xlane.xlu1 %999  ;;  %v1003_v33 = vpop.xlane.xlu0 %1002 }
 0x8ec   :  { %v1008_v34 = vmul.f32 %v1000_v35, %v928_v60  ;;  %v1009_v36 = vmul.f32 %v1003_v33, %v929_v51 }
 0x8ee   :  { %1019 = vperm.xlu1 %1362, %v1008_v34   ;;  %1022 = vperm.xlu0 %1363, %v1009_v36  }
 0x8ef   :  { %v1006_v37 = vpop.xlane.xlu0 %1005 }
 0x8f0   :  { %v1010_v39 = vmul.f32 %v1006_v37, %v930_v61 }
 0x8f2   :  { %1025 = vperm.xlu1 %1362, %v1010_v39  }
 0x965   :  { %v1017_v44 = vpop.permute.xlu0 %1016 }
 0x966   :  { %v1030_v38 = vrot.slane %v1017_v44, %v1550_v15 }
 0x969   :  { %v1020_v45 = vpop.permute.xlu1 %1019  ;;  %v1023_v46 = vpop.permute.xlu0 %1022 }
 0x96a   :  { %v1034_v12 = vrot.slane %v1020_v45, %v1550_v15  ;;  %v1038_v13 = vrot.slane %v1023_v46, %v1550_v15 }
 0x96c   :  { %v1043_v54 = vsel %vm516_vm5, %v1034_v12, %v1030_v38 }
 0x96d   :  { %v1026_v56 = vpop.permute.xlu1 %1025  ;;  %v1044_v48 = vsel %vm518_vm7, %v1038_v13, %v1043_v54 }
 0x96e   :  { %v1042_v47 = vrot.slane %v1026_v56, %v1550_v15 }
 0x970   :  { %v1045_v49 = vsel %vm520_vm8, %v1042_v47, %v1044_v48 }
 0x971   :  { %v1047_v50 = vsel %vm523_vm9, %v1045_v49, 0.0 }
 0x972   :  { %1048 = vadd.xlane.f32.xlu0 %v1047_v50 }
 0x9fb   :  { %v1049_v58 = vpop.xlane.xlu0 %1048 }
 0x9fc   :  { %v1050_v51 = vmax.f32 %v1049_v58, 0.0 }
 0x9fe   :  { %1402 = vrsqrt.f32 %v1050_v51  ;;  %vm1053_vm10 = vcmp.eq.f32.partialorder %v1050_v51, inf  ;;  %v1056_v60 = vand.u32 2147483648, %v1050_v51  ;;  %vm1055_vm15 = vcmp.eq.f32.partialorder %v1050_v51, 0.0 }
 0xa0b   :  { %v1403_v52 = vpop.eup %1402 }
 0xa0c   :  { %v1052_v55 = vmul.f32 %v1403_v52, %v1050_v51 }
 0xa0e   :  { %v1054_v57 = vsel %vm1053_vm10, %v1050_v51, %v1052_v55 }
 0xa0f   :  { %v1057_v61 = vsel %vm1055_vm15, %v1056_v60, %v1054_v57 }
 0xa10   :  { %v1058_v62 = vmax.f32 %v1057_v61, 1e-08 }
 0xa12   :  { %v1063_v63 = vrot.slane %v1058_v62, %v1586_v40  ;;  %v1067_v0 = vrot.slane %v1058_v62, %v1589_v41  ;;  %v1071_v1 = vrot.slane %v1058_v62, %v1592_v42  ;;  %v1075_v19 = vrot.slane %v1058_v62, %v1595_v43 }
 0xa14   :  { %v1080_v5 = vmul.f32 %v1063_v63, %v488_v2  ;;  %v1081_v11 = vmul.f32 %v1067_v0, %v489_v4  ;;  %v1082_v17 = vmul.f32 %v1071_v1, %v490_v6  ;;  %v1083_v20 = vmul.f32 %v1075_v19, %v491_v28 }
 0xa16   :  { %1404 = vrcp.f32 %v1080_v5 }
 0xa17   :  { %1406 = vrcp.f32 %v1081_v11 }
 0xa18   :  { %1408 = vrcp.f32 %v1082_v17 }
 0xa19   :  { %1410 = vrcp.f32 %v1083_v20 }
 0xa23   :  { %v1405_v21 = vpop.eup %1404 }
 0xa24   :  { %v1407_v22 = vpop.eup %1406  ;;  %v1088_v25 = vmul.f32 %v1405_v21, %v997_v30 }
 0xa25   :  { %v1089_v59 = vmul.f32 %v1407_v22, %v1000_v35  ;;  %v1409_v2 = vpop.eup %1408 }
 0xa26   :  { %v1092_v53 = vsel %vm152_vm2, -inf, %v1088_v25  ;;  %v1090_v4 = vmul.f32 %v1409_v2, %v1003_v33  ;;  %v1411_v6 = vpop.eup %1410 }
 0xa27   :  { %1101 = vperm.xlu1 %1362, %v1092_v53   ;;  %v1093_v3 = vsel %vm153_vm3, -inf, %v1089_v59  ;;  %v1091_v28 = vmul.f32 %v1411_v6, %v1006_v37 }
 0xa28   :  { %v1094_v23 = vsel %vm154_vm4, -inf, %v1090_v4 }
 0xa29   :  { %v1095_v26 = vsel %vm155_vm6, -inf, %v1091_v28 }
 0xa2b   :  { %1104 = vperm.xlu1 %1362, %v1093_v3  }
 0xa2f   :  { %1107 = vperm.xlu1 %1362, %v1094_v23  }
 0xa33   :  { %1110 = vperm.xlu1 %1362, %v1095_v26  }
 0xaa2   :  { %v1102_v14 = vpop.permute.xlu1 %1101 }
 0xaa3   :  { %v1115_v30 = vrot.slane %v1102_v14, %v1550_v15 }
 0xaa6   :  { %v1105_v27 = vpop.permute.xlu1 %1104 }
 0xaa7   :  { %v1119_v29 = vrot.slane %v1105_v27, %v1550_v15 }
 0xaa9   :  { %v1128_v35 = vsel %vm516_vm5, %v1119_v29, %v1115_v30 }
 0xaaa   :  { %v1108_v32 = vpop.permute.xlu1 %1107 }
 0xaab   :  { %v1123_v16 = vrot.slane %v1108_v32, %v1550_v15 }
 0xaad   :  { %v1129_v33 = vsel %vm518_vm7, %v1123_v16, %v1128_v35 }
 0xaae   :  { %v1111_v31 = vpop.permute.xlu1 %1110 }
 0xaaf   :  { %v1127_v18 = vrot.slane %v1111_v31, %v1550_v15 }
 0xab1   :  { %v1130_v24 = vsel %vm520_vm8, %v1127_v18, %v1129_v33 }
 0xab2   :  { %v1132_v34 = vsel %vm523_vm9, %v1130_v24, -inf }
 0xab3   :  { %1133 = vmax.xlane.f32.xlu1 %v1132_v34 }
 0xb3c   :  { %v1134_v36 = vpop.xlane.xlu1 %1133 }
 0xb3d   :  { %v1139_v37 = vrot.slane %v1134_v36, %v1586_v40  ;;  %v1143_v39 = vrot.slane %v1134_v36, %v1589_v41  ;;  %v1147_v44 = vrot.slane %v1134_v36, %v1592_v42  ;;  %v1151_v45 = vrot.slane %v1134_v36, %v1595_v43 }
 0xb3f   :  { %v1156_v46 = vsub.f32 %v1092_v53, %v1139_v37  ;;  %v1157_v38 = vsub.f32 %v1093_v3, %v1143_v39  ;;  %v1158_v12 = vsub.f32 %v1094_v23, %v1147_v44  ;;  %v1159_v56 = vsub.f32 %v1095_v26, %v1151_v45 }
 0xb41   :  { %v1160_v13 = vmul.f32 1.442695, %v1156_v46  ;;  %v1164_v54 = vmul.f32 1.442695, %v1158_v12  ;;  %v1162_v47 = vmul.f32 1.442695, %v1157_v38 }
 0xb42   :  { %v1166_v48 = vmul.f32 1.442695, %v1159_v56 }
 0xb43   :  { %1412 = vpow2.f32 %v1160_v13 }
 0xb44   :  { %1414 = vpow2.f32 %v1164_v54 }
 0xb45   :  { %1416 = vpow2.f32 %v1162_v47 }
 0xb46   :  { %1418 = vpow2.f32 %v1166_v48 }
 0xb50   :  { %v1413_v49 = vpop.eup %1412 }
 0xb51   :  { %1173 = vperm.xlu0 %1363, %v1413_v49   ;;  %v1415_v50 = vpop.eup %1414 }
 0xb52   :  { %1179 = vperm.xlu1 %1362, %v1415_v50   ;;  %v1417_v58 = vpop.eup %1416 }
 0xb53   :  { %v1419_v51 = vpop.eup %1418 }
 0xb55   :  { %1176 = vperm.xlu0 %1363, %v1417_v58  }
 0xb59   :  { %1182 = vperm.xlu0 %1363, %v1419_v51  }
 0xbcc   :  { %v1174_v52 = vpop.permute.xlu0 %1173 }
 0xbcd   :  { %v1180_v60 = vpop.permute.xlu1 %1179  ;;  %v1187_v57 = vrot.slane %v1174_v52, %v1550_v15 }
 0xbce   :  { %v1195_v63 = vrot.slane %v1180_v60, %v1550_v15 }
 0xbd0   :  { %v1177_v55 = vpop.permute.xlu0 %1176 }
 0xbd1   :  { %v1191_v61 = vrot.slane %v1177_v55, %v1550_v15 }
 0xbd3   :  { %v1200_v62 = vsel %vm516_vm5, %v1191_v61, %v1187_v57 }
 0xbd4   :  { %v1183_v0 = vpop.permute.xlu0 %1182  ;;  %v1201_v5 = vsel %vm518_vm7, %v1195_v63, %v1200_v62 }
 0xbd5   :  { %v1199_v1 = vrot.slane %v1183_v0, %v1550_v15 }
 0xbd7   :  { %v1202_v11 = vsel %vm520_vm8, %v1199_v1, %v1201_v5 }
 0xbd8   :  { %v1204_v17 = vsel %vm523_vm9, %v1202_v11, 0.0 }
 0xbd9   :  { %1205 = vadd.xlane.f32.xlu0 %v1204_v17 }
 0xc62   :  { %v1206_v19 = vpop.xlane.xlu0 %1205 }
 0xc63   :  { %1420 = vrcp.f32 %v1206_v19 }
 0xc70   :  { %v1421_v20 = vpop.eup %1420 }
 0xc71   :  { %v1212_v21 = vrot.slane %v1421_v20, %v1586_v40  ;;  %v1216_v25 = vrot.slane %v1421_v20, %v1589_v41  ;;  %v1220_v59 = vrot.slane %v1421_v20, %v1592_v42  ;;  %v1224_v2 = vrot.slane %v1421_v20, %v1595_v43 }
 0xc73   :  { %v1229_v22 = vmul.f32 %v1413_v49, %v1212_v21  ;;  %v1230_v53 = vmul.f32 %v1417_v58, %v1216_v25  ;;  %v1231_v15 = vmul.f32 %v1415_v50, %v1220_v59  ;;  %v1232_v3 = vmul.f32 %v1419_v51, %v1224_v2 }
 0xc75   :  { %1235 = vperm.xlu1 %1362, %v1229_v22  }
 0xc79   :  { %1240 = vperm.xlu1 %1362, %v1230_v53  }
 0xc7d   :  { %1245 = vperm.xlu1 %1362, %v1231_v15  }
 0xc81   :  { %1250 = vperm.xlu1 %1362, %v1232_v3  }
 0xcf0   :  { %v1236_v4 = vpop.permute.xlu1 %1235 }
 0xcf1   :  { %v1253_v6 = vmul.f32 %v1236_v4, %v1521_v8 }
 0xcf3   :  { %v1257_v23 = vrot.slane %v1253_v6, 4 }
 0xcf4   :  { %v1241_v28 = vpop.permute.xlu1 %1240 }
 0xcf5   :  { %v1254_v40 = vmul.f32 %v1519_v7, %v1241_v28  ;;  %v1258_v26 = vadd.f32 %v1257_v23, %v1253_v6 }
 0xcf7   :  { %v1263_v41 = vrot.slane %v1254_v40, 4  ;;  %v1259_v32 = vrot.slane %v1258_v26, 2 }
 0xcf8   :  { %v1246_v14 = vpop.permute.xlu1 %1245 }
 0xcf9   :  { %v1264_v27 = vadd.f32 %v1263_v41, %v1254_v40  ;;  %v1255_v42 = vmul.f32 %v1246_v14, %v1527_v10  ;;  %v1260_v18 = vadd.f32 %v1259_v32, %v1258_v26 }
 0xcfb   :  { %v1265_v29 = vrot.slane %v1264_v27, 2  ;;  %v1269_v16 = vrot.slane %v1255_v42, 4  ;;  %v1261_v36 = vrot.slane %v1260_v18, 1 }
 0xcfc   :  { %v1251_v43 = vpop.permute.xlu1 %1250 }
 0xcfd   :  { %v1266_v30 = vadd.f32 %v1265_v29, %v1264_v27  ;;  %v1270_v31 = vadd.f32 %v1269_v16, %v1255_v42  ;;  %v1256_v35 = vmul.f32 %v1525_v9, %v1251_v43  ;;  %v1262_v46 = vadd.f32 %v1261_v36, %v1260_v18 }
 0xcff   :  { %v1271_v8 = vrot.slane %v1270_v31, 2  ;;  %v1275_v33 = vrot.slane %v1256_v35, 4  ;;  %v1267_v24 = vrot.slane %v1266_v30, 1 }
 0xd01   :  { %v1272_v34 = vadd.f32 %v1271_v8, %v1270_v31  ;;  %v1276_v7 = vadd.f32 %v1275_v33, %v1256_v35  ;;  %v1268_v44 = vadd.f32 %v1267_v24, %v1266_v30 }
 0xd03   :  { %v1273_v37 = vrot.slane %v1272_v34, 1  ;;  %v1277_v39 = vrot.slane %v1276_v7, 2  ;;  %v1285_v13 = vsel %vm516_vm5, %v1268_v44, %v1262_v46 }
 0xd05   :  { %v1278_v45 = vadd.f32 %v1277_v39, %v1276_v7  ;;  %v1274_v10 = vadd.f32 %v1273_v37, %v1272_v34 }
 0xd07   :  { %v1279_v38 = vrot.slane %v1278_v45, 1  ;;  %v1286_v9 = vsel %vm518_vm7, %v1274_v10, %v1285_v13 }
 0xd09   :  { %v1280_v12 = vadd.f32 %v1279_v38, %v1278_v45 }
 0xd0b   :  { %v1287_v54 = vsel %vm520_vm8, %v1280_v12, %v1286_v9 }
 0xd0c   :  { %1289 = vst [vmem:[#allocation7] sm:$0xf] %v1287_v54 }
 0xd0d   :  { %1473 = shalt.err (!%p1470_p0)
}
 0xd0e   :  { %1299 = dma.vmem_to_hbm [thread:$0]  %s1297_s1, 64, %s1803_s2, [#allocation4]  }
 0xd0f   :  { %1486 = dma.done.wait [#allocation4], 64  }
 0xd10   :  { %1487 = vsyncadd [#allocation4], 4294967232 }
 0xd11   :  { %1303 = vsyncpa [#allocation3], 1 }
 0xd12   :  { %1304 = vsyncpa [#allocation6], 1 }
 0xd13   :  { %1305 = vsyncpa [#allocation4], 1 }

</bundles_post_ra>
